<compile_context>
chip_gen: v7x
topology: tpu7x:2x2x1
jax: 0.10.0
libtpu: 0.0.40
codegen_flags: <defaults>
</compile_context>

<pallas_src>
import functools
import math

import jax
import jax.numpy as jnp
from jax.experimental import pallas as pl
from jax.experimental.pallas import tpu as pltpu


# ----------------------------------------------------------------------------
# PE table construction (matches the PyTorch buffer, float32).
# ----------------------------------------------------------------------------
@functools.lru_cache(maxsize=None)
def _build_pe(max_len: int, d_model: int) -> jnp.ndarray:
    """Sinusoidal positional-encoding table, shape (max_len, d_model), float32."""
    position = jnp.arange(0, max_len, dtype=jnp.float32)[:, None]              # (max_len, 1)
    div_term = jnp.exp(
        jnp.arange(0, d_model, 2, dtype=jnp.float32) * -(math.log(10000.0) / d_model)
    )                                                                            # (d_model//2,)
    angles = position * div_term                                                 # (max_len, d_model//2)
    pe = jnp.zeros((max_len, d_model), dtype=jnp.float32)
    pe = pe.at[:, 0::2].set(jnp.sin(angles))
    pe = pe.at[:, 1::2].set(jnp.cos(angles))
    return pe


# ----------------------------------------------------------------------------
# Kernel body: broadcast add, single full-tile store (VPU only, mem-bound).
# ----------------------------------------------------------------------------
def _pe_add_kernel(x_ref, pe_ref, o_ref):
    # x_ref: (TB, TR, C), pe_ref: (1, TR, C).  Dropout is identity (inference).
    o_ref[...] = x_ref[...] + pe_ref[...]


# ----------------------------------------------------------------------------
# Tiling heuristics.
# ----------------------------------------------------------------------------
def _sublane_granularity(itemsize: int) -> int:
    # Native sublane packing: 8 rows for 32-bit, 16 for 16-bit, 32 for 8-bit dtypes.
    return max(8, 32 // max(1, itemsize))


def _largest_divisor_leq(n: int, cap: int) -> int:
    cap = max(1, min(n, cap))
    for d in range(cap, 0, -1):
        if n % d == 0:
            return d
    return 1


def _pick_cols(seq: int, d_model: int) -> int:
    """Lane width of the per-batch plane view.

    If S*D is a multiple of 128, flatten to a lane-dense (R, C) view (unmasked
    stores).  Otherwise keep the natural (S, D) layout (full-D lanes, row-tiled
    over S) so blocks stay bounded for long sequences.
    """
    n = seq * d_model
    if n % 128 != 0:
        return d_model
    if n <= 4096:
        return n
    for c in (2048, 1024, 512, 256):
        if n % c == 0:
            return c
    return 128


def _pick_rows(r: int, c: int, itemsize: int, target_bytes: int, gran: int) -> int:
    """Largest row tile that divides r, is a multiple of gran, and fits target_bytes."""
    if r <= gran:
        return r
    cap = max(gran, (target_bytes // max(1, c * itemsize)) // gran * gran)
    tr = min((r // gran) * gran, cap)
    while tr >= gran:
        if r % tr == 0:
            return tr
        tr -= gran
    return r  # no gran-multiple divisor: full extent is always a legal block dim


def _device_kind() -> str:
    try:
        return jax.devices()[0].device_kind.lower()
    except Exception:
        return ""


def _default_target_block_bytes() -> int:
    kind = _device_kind()
    # v6e / v7x: 32 MiB scoped-VMEM default comfortably holds ~4 MiB blocks with
    # x / pe / out double-buffered; higher HBM BW (esp. v7x 3.2 TB/s) wants them.
    if "v6" in kind or "v7" in kind:
        return 4 << 20
    # v5e (16 MiB scoped default) and anything unknown: stay at 2 MiB.
    return 2 << 20


def _multi_core() -> bool:
    kind = _device_kind()
    if "lite" in kind or "v5e" in kind or "v6" in kind:
        return False
    return ("v7" in kind) or ("v4" in kind) or ("v5p" in kind)


def _plan_blocks(batch: int, rows: int, cols: int, itemsize: int, target_bytes: int):
    """Choose (row_tile, batch_tile) with block bytes ~<= target_bytes."""
    gran = _sublane_granularity(itemsize)
    plane_bytes = rows * cols * itemsize
    if plane_bytes >= target_bytes:
        tr = _pick_rows(rows, cols, itemsize, target_bytes, gran)
        tb = 1
    else:
        # Intermediate batch fold: aggregate whole planes up to the byte target.
        tr = rows
        tb = _largest_divisor_leq(batch, max(1, target_bytes // max(1, plane_bytes)))

    # Multi-TensorCore parts: make sure non-tiny problems get >= 2 parallel steps.
    total_bytes = batch * plane_bytes
    if _multi_core() and total_bytes >= (1 << 20) and (rows // tr) * (batch // tb) < 2:
        if batch > 1:
            tb = _largest_divisor_leq(batch, batch // 2)
        else:
            cand = ((tr // 2) // gran) * gran
            while cand >= gran:
                if rows % cand == 0:
                    tr = cand
                    break
                cand -= gran
    return tr, tb


# ----------------------------------------------------------------------------
# Module-style wrapper (mirrors the PyTorch module; dropout = identity).
# ----------------------------------------------------------------------------
class PositionalEncoding:
    def __init__(self, d_model: int, dropout: float, max_len: int = 5000):
        self.d_model = d_model
        self.dropout_p = dropout            # inference mode -> identity
        self.max_len = max_len
        self.pe = _build_pe(max_len, d_model)       # (max_len, d_model), float32
        self._slab_cache = {}               # (S, R, C, dtype) -> (1, R, C) device array

    def _pe_slab(self, seq: int, rows: int, cols: int, dtype) -> jnp.ndarray:
        key = (seq, rows, cols, jnp.dtype(dtype).name)
        slab = self._slab_cache.get(key)
        if slab is None:
            slab = self.pe[:seq, :].reshape(1, rows, cols).astype(dtype)
            self._slab_cache[key] = slab
        return slab

    def __call__(self, x: jnp.ndarray, *, target_block_bytes: int | None = None,
                 donate_x: bool = False) -> jnp.ndarray:
        B, S, D = x.shape
        assert D == self.d_model and S <= self.max_len
        itemsize = jnp.dtype(x.dtype).itemsize
        target = target_block_bytes or _default_target_block_bytes()

        C = _pick_cols(S, D)                       # lane-dense when S*D % 128 == 0
        R = (S * D) // C
        TR, TB = _plan_blocks(B, R, C, itemsize, target)

        x3 = x.reshape(B, R, C)                    # free, row-major-consistent reshape
        pe3 = self._pe_slab(S, R, C, x.dtype)      # cached: no per-call materialization

        grid = (R // TR, B // TB)                  # batch innermost -> PE tile reused

        compiler_kwargs = dict(dimension_semantics=("parallel", "parallel"))
        # Worst-case pipeline VMEM: x + out + pe blocks, all double-buffered.
        pipeline_bytes = 2 * (2 * TB * TR * C + TR * C) * itemsize
        if pipeline_bytes > (24 << 20):            # only when a legality fallback blew up blocks
            compiler_kwargs["vmem_limit_bytes"] = min(pipeline_bytes + (8 << 20), 64 << 20)

        call_kwargs = {}
        if donate_x:
            call_kwargs["input_output_aliases"] = {0: 0}   # footprint win only, not bandwidth

        out3 = pl.pallas_call(
            _pe_add_kernel,
            out_shape=jax.ShapeDtypeStruct((B, R, C), x.dtype),
            grid_spec=pltpu.PrefetchScalarGridSpec(
                num_scalar_prefetch=0,
                grid=grid,
                in_specs=[
                    pl.BlockSpec((TB, TR, C), lambda r, b: (b, r, 0)),   # x tile
                    pl.BlockSpec((1, TR, C), lambda r, b: (0, r, 0)),    # PE tile (batch-invariant)
                ],
                out_specs=pl.BlockSpec((TB, TR, C), lambda r, b: (b, r, 0)),
            ),
            compiler_params=pltpu.CompilerParams(**compiler_kwargs),
            **call_kwargs,
        )(x3, pe3)

        return out3.reshape(B, S, D)


if __name__ == "__main__":
    # Small deterministic config consistent with the module.
    d_model = 32
    dropout_p = 0.1          # inference mode -> identity
    max_len = 64
    batch, seq = 2, 8

    key = jax.random.PRNGKey(0)
    x = jax.random.normal(key, (batch, seq, d_model), dtype=jnp.float32)

    module = PositionalEncoding(d_model, dropout_p, max_len=max_len)
    out = jax.block_until_ready(module(x))

    # Reference of the intended semantics: x + pe[:, :S, :] (dropout identity).
    ref = x + module.pe[None, :seq, :]
    assert out.shape == (batch, seq, d_model)
    assert jnp.allclose(out, ref, atol=1e-6), "mismatch vs reference"

    # Exercise the cache path once more (same shape -> slab reused, no re-cast).
    out2 = jax.block_until_ready(module(x))
    assert jnp.allclose(out2, ref, atol=1e-6)

    print("KERNEL_OK")
</pallas_src>

<mosaic_0001>
module attributes {stable_mosaic.version = 11 : i64} {
  func.func @_pe_add_kernel(%arg0: i32, %arg1: i32, %arg2: memref<2x1x256xf32, #tpu.memory_space<vmem>>, %arg3: memref<1x1x256xf32, #tpu.memory_space<vmem>>, %arg4: memref<2x1x256xf32, #tpu.memory_space<vmem>>) attributes {dimension_semantics = [#tpu.dimension_semantics<parallel>, #tpu.dimension_semantics<parallel>], iteration_bounds = array<i64: 1, 1>, scalar_prefetch = 0 : i64, scratch_operands = 0 : i64, tpu.core_type = #tpu.core_type<tc>, window_params = [{transform_indices = @transform_0, window_bounds = array<i64: 2, 1, 256>}, {transform_indices = @transform_1, window_bounds = array<i64: 1, 1, 256>}, {transform_indices = @transform_2, window_bounds = array<i64: 2, 1, 256>}]} {
    %c0 = arith.constant 0 : index
    %c0_0 = arith.constant 0 : index
    %c0_1 = arith.constant 0 : index
    %0 = vector.load %arg2[%c0, %c0_0, %c0_1] : memref<2x1x256xf32, #tpu.memory_space<vmem>>, vector<2x1x256xf32>
    %c0_2 = arith.constant 0 : index
    %c0_3 = arith.constant 0 : index
    %c0_4 = arith.constant 0 : index
    %1 = vector.load %arg3[%c0_2, %c0_3, %c0_4] : memref<1x1x256xf32, #tpu.memory_space<vmem>>, vector<1x1x256xf32>
    %2 = vector.broadcast %1 : vector<1x1x256xf32> to vector<2x1x256xf32>
    %3 = arith.addf %0, %2 : vector<2x1x256xf32>
    %c0_5 = arith.constant 0 : index
    %c0_6 = arith.constant 0 : index
    %c0_7 = arith.constant 0 : index
    %4 = vector.load %arg4[%c0_5, %c0_6, %c0_7] : memref<2x1x256xf32, #tpu.memory_space<vmem>>, vector<2x1x256xf32>
    tpu.vector_store %arg4[%c0_5, %c0_6, %c0_7], %3 {strides = array<i32>} : memref<2x1x256xf32, #tpu.memory_space<vmem>>, vector<2x1x256xf32>,
    return
  }
  func.func @transform_0(%arg0: i32, %arg1: i32) -> (i32, i32, i32) {
    %c0_i32 = arith.constant 0 : i32
    %c0_i32_0 = arith.constant 0 : i32
    return %arg1, %arg0, %c0_i32 : i32, i32, i32
  }
  func.func @transform_1(%arg0: i32, %arg1: i32) -> (i32, i32, i32) {
    %c0_i32 = arith.constant 0 : i32
    %c0_i32_0 = arith.constant 0 : i32
    %c0_i32_1 = arith.constant 0 : i32
    return %c0_i32, %arg0, %c0_i32_0 : i32, i32, i32
  }
  func.func @transform_2(%arg0: i32, %arg1: i32) -> (i32, i32, i32) {
    %c0_i32 = arith.constant 0 : i32
    %c0_i32_0 = arith.constant 0 : i32
    return %arg1, %arg0, %c0_i32 : i32, i32, i32
  }
}

</mosaic_0001>

<bundles_post_ra>
// kernel: tpu_custom_call.1
= control target key start
LH: loop header
LB: loop body
LE: loop exit
PB: predicated region body
PF: predicated region fallthrough
CT: control target
= control target key end

     0   :  { %7 = vsyncpa [#allocation3], 0  ;;  %s158_s0 = inlined_call_operand.hbm [shape: f32[2,1,256], index: 0, kind: input, shape index: {}]   ;;  %s159_s1 = inlined_call_operand.vmem [shape: f32[1,1,256], index: 1, kind: input, shape index: {}]   ;;  %s160_s2 = inlined_call_operand.hbm [shape: f32[2,1,256], index: 2, kind: output, shape index: {}]  }
   0x1   :  { %8 = vsyncpa [#allocation4], 0  ;;  %s106_s9 = smov [#allocation2]   ;;  %s58_s13 = scalar_lea.hbm %s158_s0, 64 }
   0x2   :  { %s14_s10 = sshll.u32 %s106_s9, 4  ;;  %p59_p0 = scmp.ne.s32.totalorder %s158_s0, %s58_s13  ;;  %s15_s10 = int_to_ptr.vmem [resolvable:$true] %s14_s10 }
   0x3   :  { %p62_p1 = scmp.lt.u32.totalorder %s58_s13, %s158_s0 }
   0x5   :  { %p64_p2 = pnand %p62_p1, %p59_p0 }
   0x7   :  { %67 = shalt.err (!%p64_p2)
}
   0x8   :  { %s68_s18 = scalar_lea.vmem %s15_s10, 64  ;;  %p73_p4 = scmp.lt.s32.totalorder %s15_s10, %s15_s10 }
   0x9   :  { %p69_p3 = scmp.ne.s32.totalorder %s15_s10, %s68_s18  ;;  %p74_p5 = scmp.lt.s32.totalorder %s68_s18, %s68_s18 }
   0xb   :  { %p75_p6 = por %p74_p5, %p73_p4 }
   0xd   :  { %p76_p7 = pnand %p75_p6, %p69_p3 }
   0xf   :  { %79 = shalt.err (!%p76_p7)
}
  0x10   :  { %s107_s19 = smov 32   ;;  %s108_s20 = smov 2  }
  0x11   :  { %20 = dma.hbm_to_vmem [thread:$0]  %s158_s0, 64, %s15_s10, [#allocation3], %s107_s19, %s107_s19, %s108_s20  }
  0x12   :  { %102 = dma.done.wait [#allocation3], 64  }
  0x13   :  { %103 = vsyncadd [#allocation3], 4294967232  ;;  %v31_v0 = vlaneseq  ;;  %s109_s23 = smov [#allocation5]   ;;  %v26_v1 = vld [vmem:[#allocation2] sm:$0x3] }
  0x14   :  { %s42_s24 = sshll.u32 %s109_s23, 4  ;;  %v28_v2 = vld [vmem:[%s159_s1] sm:$0x3]  ;;  %v27_v3 = vld [vmem:[#allocation2 + $0x2] sm:$0x3]  ;;  %s43_s24 = int_to_ptr.vmem [resolvable:$true] %s42_s24 }
  0x15   :  { %vm33_vm0 = vcmp.lt.s32.totalorder %v31_v0, 256  ;;  %v29_v4 = vadd.f32 %v28_v2, %v26_v1  ;;  %v30_v5 = vadd.f32 %v28_v2, %v27_v3  ;;  %s80_s27 = scalar_lea.vmem %s43_s24, 64  ;;  %p85_p9 = scmp.lt.s32.totalorder %s43_s24, %s43_s24 }
  0x16   :  { %p81_p8 = scmp.ne.s32.totalorder %s43_s24, %s80_s27  ;;  %p86_p10 = scmp.lt.s32.totalorder %s80_s27, %s80_s27 }
  0x17   :  { %35 = vst.msk [vmem:[#allocation5] sm:$0x3] %vm33_vm0, %v29_v4  ;;  %36 = vst.msk [vmem:[#allocation5 + $0x2] sm:$0x3] %vm33_vm0, %v30_v5 }
  0x18   :  { %p87_p11 = por %p86_p10, %p85_p9 }
  0x1a   :  { %p88_p12 = pnand %p87_p11, %p81_p8 }
  0x1c   :  { %91 = shalt.err (!%p88_p12)
}
  0x1d   :  { %s92_s29 = scalar_lea.hbm %s160_s2, 64 }
  0x1e   :  { %p93_p13 = scmp.ne.s32.totalorder %s160_s2, %s92_s29  ;;  %p96_p0 = scmp.lt.u32.totalorder %s92_s29, %s160_s2 }
  0x20   :  { %p98_p1 = pnand %p96_p0, %p93_p13 }
  0x22   :  { %101 = shalt.err (!%p98_p1)
}
  0x23   :  { %48 = dma.vmem_to_hbm [thread:$0]  %s43_s24, 64, %s160_s2, [#allocation4], %s107_s19, %s107_s19, %s108_s20  }
  0x24   :  { %104 = dma.done.wait [#allocation4], 64  }
  0x25   :  { %105 = vsyncadd [#allocation4], 4294967232 }
  0x26   :  { %52 = vsyncpa [#allocation3], 1 }
  0x27   :  { %53 = vsyncpa [#allocation4], 1 }

</bundles_post_ra>
